<compile_context>
chip_gen: v6e
topology: v6e:2x2x1
jax: 0.10.0
libtpu: 0.0.40
codegen_flags: <defaults>
</compile_context>

<pallas_src>
import functools

import jax
import jax.numpy as jnp
from jax.experimental import pallas as pl
from jax.experimental.pallas import tpu as pltpu  # noqa: F401  (kept for TPU-specific params if tiles grow)


def _attn_kernel(q_ref, kv_ref, o_ref, *, emb):
    # q: (B, Tq, E), kv: (B, T, E)  — kv serves as both keys and values.
    # Fold both 1/sqrt(emb) factors into a single 1/emb multiply on Q.
    q = q_ref[...].astype(jnp.float32) * (1.0 / emb)
    kv = kv_ref[...].astype(jnp.float32)

    # logits = (q / emb) @ k^T  -> (B, Tq, T)   (contraction over E)
    dot = jnp.einsum("bqe,bke->bqk", q, kv,
                     preferred_element_type=jnp.float32)

    # softmax over the key axis (PyTorch dim=2), numerically stable.
    dot = dot - jnp.max(dot, axis=-1, keepdims=True)
    e = jnp.exp(dot)
    inv = pl.reciprocal(jnp.sum(e, axis=-1, keepdims=True), approx=True)
    p = e * inv

    # out = p @ v -> (B, Tq, E)
    o_ref[...] = jnp.einsum("bqk,bke->bqe", p, kv,
                            preferred_element_type=jnp.float32).astype(o_ref.dtype)


def self_attention_simple(x0, x1, emb):
    """x0: (B, T, E) keys/values, x1: (Tq, B, E) queries. Returns squeeze((B, Tq, E))."""
    q = jnp.transpose(x1, (1, 0, 2))                    # (B, Tq, E)  -- layout glue
    B, Tq, E = q.shape
    _, T, _ = x0.shape

    out = pl.pallas_call(
        functools.partial(_attn_kernel, emb=emb),
        out_shape=jax.ShapeDtypeStruct((B, Tq, E), x0.dtype),
        # Single grid step: whole problem (~2 KB) lives in VMEM at once.
        in_specs=[
            pl.BlockSpec((B, Tq, E), lambda: (0, 0, 0)),   # queries
            pl.BlockSpec((B, T, E), lambda: (0, 0, 0)),    # keys AND values (one DMA)
        ],
        out_specs=pl.BlockSpec((B, Tq, E), lambda: (0, 0, 0)),
    )(q, x0)

    return jnp.squeeze(out)                             # matches torch .squeeze()


def _reference(x0, x1, emb):
    q = jnp.transpose(x1, (1, 0, 2)) / (emb ** 0.5)     # (B, Tq, E)
    k = jnp.transpose(x0, (0, 2, 1)) / (emb ** 0.5)     # (B, E, T)
    v = x0                                              # (B, T, E)
    dot = jnp.einsum("bqe,bet->bqt", q, k)
    dot = jax.nn.softmax(dot, axis=2)
    out = jnp.einsum("bqt,bte->bqe", dot, v)
    return jnp.squeeze(out)


if __name__ == "__main__":
    # Small shapes consistent with the module's forward:
    #   x[0]: (B, T, E) = (2, 8, 32)     (keys / values)
    #   x[1]: (Tq, B, E) = (1, 2, 32)    (queries, permuted inside forward)
    B, T, Tq, E = 2, 8, 1, 32
    key = jax.random.PRNGKey(0)
    k0, k1 = jax.random.split(key)
    x0 = jax.random.normal(k0, (B, T, E), dtype=jnp.float32)
    x1 = jax.random.normal(k1, (Tq, B, E), dtype=jnp.float32)

    out = self_attention_simple(x0, x1, emb=E)
    out = jax.block_until_ready(out)

    ref = _reference(x0, x1, emb=E)
    assert out.shape == ref.shape, (out.shape, ref.shape)
    # Tolerance relaxed slightly for the EUP approximate reciprocal (~2^-12 rel).
    assert jnp.allclose(out, ref, atol=1e-3, rtol=1e-3), "mismatch vs reference"

    print("KERNEL_OK")
</pallas_src>

<mosaic_0001>
module attributes {stable_mosaic.version = 11 : i64} {
  func.func @_attn_kernel(%arg0: memref<2x1x32xf32, #tpu.memory_space<vmem>>, %arg1: memref<2x8x32xf32, #tpu.memory_space<vmem>>, %arg2: memref<2x1x32xf32, #tpu.memory_space<vmem>>) attributes {dimension_semantics = [], scalar_prefetch = 0 : i64, scratch_operands = 0 : i64, tpu.core_type = #tpu.core_type<tc>} {
    %c0 = arith.constant 0 : index
    %c0_0 = arith.constant 0 : index
    %c0_1 = arith.constant 0 : index
    %0 = vector.load %arg0[%c0, %c0_0, %c0_1] : memref<2x1x32xf32, #tpu.memory_space<vmem>>, vector<2x1x32xf32>
    %cst = arith.constant 3.125000e-02 : f32
    %1 = vector.broadcast %cst : f32 to vector<2x1x32xf32>
    %2 = arith.mulf %0, %1 : vector<2x1x32xf32>
    %c0_2 = arith.constant 0 : index
    %c0_3 = arith.constant 0 : index
    %c0_4 = arith.constant 0 : index
    %3 = vector.load %arg1[%c0_2, %c0_3, %c0_4] : memref<2x8x32xf32, #tpu.memory_space<vmem>>, vector<2x8x32xf32>
    "tpu.trace_start"() <{level = 10 : i32, message = "bqe,bke->bqk"}> : () -> ()
    %cst_5 = arith.constant dense<0.000000e+00> : vector<2x1x8xf32>
    %4 = tpu.matmul %2, %3, %cst_5 {dimension_numbers = #tpu.dot_dimension_numbers<[2], [2], [1], [1], [0, 0, 0, 1, 1, 1], [0], [0]>} : vector<2x1x32xf32>, vector<2x8x32xf32>, vector<2x1x8xf32> -> vector<2x1x8xf32>
    "tpu.trace_stop"() : () -> ()
    %cst_6 = arith.constant dense<0xFF800000> : vector<2x1xf32>
    %5 = vector.multi_reduction <maximumf>, %4, %cst_6 [2] : vector<2x1x8xf32> to vector<2x1xf32>
    %6 = vector.shape_cast %5 : vector<2x1xf32> to vector<2x1x1xf32>
    %7 = vector.broadcast %6 : vector<2x1x1xf32> to vector<2x1x8xf32>
    %8 = arith.subf %4, %7 : vector<2x1x8xf32>
    %9 = math.exp %8 : vector<2x1x8xf32>
    %cst_7 = arith.constant dense<0.000000e+00> : vector<2x1xf32>
    %10 = vector.multi_reduction <add>, %9, %cst_7 [2] : vector<2x1x8xf32> to vector<2x1xf32>
    %11 = vector.shape_cast %10 : vector<2x1xf32> to vector<2x1x1xf32>
    %12 = tpu.reciprocal %11 {approx = true} : vector<2x1x1xf32> -> vector<2x1x1xf32>
    %13 = vector.broadcast %12 : vector<2x1x1xf32> to vector<2x1x8xf32>
    %14 = arith.mulf %9, %13 : vector<2x1x8xf32>
    "tpu.trace_start"() <{level = 10 : i32, message = "bqk,bke->bqe"}> : () -> ()
    %cst_8 = arith.constant dense<0.000000e+00> : vector<2x1x32xf32>
    %15 = tpu.matmul %14, %3, %cst_8 {dimension_numbers = #tpu.dot_dimension_numbers<[2], [1], [1], [2], [0, 0, 0, 1, 1, 2], [0], [0]>} : vector<2x1x8xf32>, vector<2x8x32xf32>, vector<2x1x32xf32> -> vector<2x1x32xf32>
    "tpu.trace_stop"() : () -> ()
    %c0_9 = arith.constant 0 : index
    %c0_10 = arith.constant 0 : index
    %c0_11 = arith.constant 0 : index
    %16 = vector.load %arg2[%c0_9, %c0_10, %c0_11] : memref<2x1x32xf32, #tpu.memory_space<vmem>>, vector<2x1x32xf32>
    tpu.vector_store %arg2[%c0_9, %c0_10, %c0_11], %15 {strides = array<i32>} : memref<2x1x32xf32, #tpu.memory_space<vmem>>, vector<2x1x32xf32>,
    return
  }
}

</mosaic_0001>

<bundles_post_ra>
// kernel: tpu_custom_call.1
= control target key start
LH: loop header
LB: loop body
LE: loop exit
PB: predicated region body
PF: predicated region fallthrough
CT: control target
= control target key end

     0   :  { %7 = vsyncpa [#allocation3], 0  ;;  %s554_s0 = inlined_call_operand.hbm [shape: f32[2,1,32], index: 0, kind: input, shape index: {}]   ;;  %s555_s1 = inlined_call_operand.hbm [shape: f32[2,8,32], index: 1, kind: input, shape index: {}]   ;;  %s556_s2 = inlined_call_operand.hbm [shape: f32[2,1,32], index: 2, kind: output, shape index: {}]  }
   0x1   :  { %8 = vsyncpa [#allocation6], 0 }
   0x2   :  { %9 = vsyncpa [#allocation4], 0  ;;  %s507_s9 = smov [#allocation2]  }
   0x3   :  { %s15_s10 = sshll.u32 %s507_s9, 4  ;;  %s16_s10 = int_to_ptr.vmem [resolvable:$true] %s15_s10 }
   0x4   :  { %s449_s11 = scalar_lea.vmem %s16_s10, 32  ;;  %p454_p1 = scmp.lt.s32.totalorder %s16_s10, %s16_s10 }
   0x5   :  { %p450_p0 = scmp.ne.s32.totalorder %s16_s10, %s449_s11  ;;  %p455_p2 = scmp.lt.s32.totalorder %s449_s11, %s449_s11 }
   0x7   :  { %p456_p3 = por %p455_p2, %p454_p1 }
   0x9   :  { %p457_p4 = pnand %p456_p3, %p450_p0 }
   0xb   :  { %460 = shalt.err (!%p457_p4)
}
   0xc   :  { %s508_s12 = smov 16   ;;  %s509_s13 = smov 1  }
   0xd   :  { %21 = dma.hbm_to_vmem [thread:$0]  %s554_s0, 32, %s16_s10, [#allocation3], %s508_s12, %s508_s12, %s509_s13  }
   0xe   :  { %s510_s16 = smov [#allocation5]  }
   0xf   :  { %s27_s17 = sshll.u32 %s510_s16, 4  ;;  %s28_s17 = int_to_ptr.vmem [resolvable:$true] %s27_s17 }
  0x10   :  { %s469_s18 = scalar_lea.vmem %s28_s17, 256  ;;  %p474_p6 = scmp.lt.s32.totalorder %s28_s17, %s28_s17 }
  0x11   :  { %p470_p5 = scmp.ne.s32.totalorder %s28_s17, %s469_s18  ;;  %p475_p7 = scmp.lt.s32.totalorder %s469_s18, %s469_s18 }
  0x13   :  { %p476_p8 = por %p475_p7, %p474_p6 }
  0x15   :  { %p477_p9 = pnand %p476_p8, %p470_p5 }
  0x17   :  { %480 = shalt.err (!%p477_p9)
}
  0x18   :  { %s511_s19 = smov 128   ;;  %s512_s20 = smov 8  }
  0x19   :  { %33 = dma.hbm_to_vmem [thread:$0]  %s555_s1, 256, %s28_s17, [#allocation6], %s511_s19, %s511_s19, %s512_s20  }
  0x1a   :  { %501 = dma.done.wait [#allocation3], 32  }
  0x1b   :  { %502 = vsyncadd [#allocation3], 4294967264 }
  0x1c   :  { %503 = dma.done.wait [#allocation6], 256  }
  0x1d   :  { %504 = vsyncadd [#allocation6], 4294967040  ;;  %v513_v0 = vmov 0.0   ;;  %vm514_vm0 = vmmov 0   ;;  %vm46_vm1 = vcmask 261120   ;;  %v44_v1 = vld [vmem:[#allocation5] sm:$0xff] }
  0x1e   :  { %404 = vmatprep.subr.mxu0 %v513_v0  ;;  %409 = vmatprep.subr.mxu1 %v513_v0  ;;  %v45_v2 = vld [vmem:[#allocation5 + $0x8] sm:$0xff]  ;;  %v40_v3 = vld [vmem:[#allocation2] sm:$0x1]  ;;  %v41_v5 = vld [vmem:[#allocation2 + $0x1] sm:$0x1]  ;;  %vm199_vm2 = vcmask 57344  }
  0x1f   :  { %406 = vmatprep.mubr.msk.f32.mxu0 %vm514_vm0, %v513_v0  ;;  %411 = vmatprep.mubr.msk.f32.mxu1 %vm514_vm0, %v513_v0  ;;  %v42_v4 = vmul.f32 0.03125, %v40_v3  ;;  %v43_v6 = vmul.f32 0.03125, %v41_v5  ;;  %vm222_vm3 = vcmask 64512   ;;  %vm369_vm4 = vcmask 253952   ;;  %s515_s0 = smov [#allocation7]  }
  0x20   :  { %405 = vmatpush3.xpose.msk.msra.mxu0 %vm46_vm1, %v44_v1  ;;  %410 = vmatpush3.xpose.msk.msra.mxu1 %vm46_vm1, %v45_v2  ;;  %s377_s1 = sshll.u32 %s515_s0, 4  ;;  %s378_s1 = int_to_ptr.vmem [resolvable:$true] %s377_s1 }
  0x21   :  { %414 = vmatprep.subr.mxu0 %v513_v0  ;;  %419 = vmatprep.subr.mxu1 %v513_v0  ;;  %s481_s23 = scalar_lea.vmem %s378_s1, 32  ;;  %p486_p11 = scmp.lt.s32.totalorder %s378_s1, %s378_s1 }
  0x22   :  { %p482_p10 = scmp.ne.s32.totalorder %s378_s1, %s481_s23  ;;  %p487_p12 = scmp.lt.s32.totalorder %s481_s23, %s481_s23 }
  0x23   :  { %407 = vmatmul.mubr.msk.f32.vlgmr.msra.gmra.mxu0 %vm46_vm1, %v42_v4  ;;  %412 = vmatmul.mubr.msk.f32.vlgmr.msra.gmra.mxu1 %vm46_vm1, %v43_v6 }
  0x24   :  { %415 = vmatpush3.msra.mxu0 %v44_v1  ;;  %416 = vmatprep.mubr.msk.f32.mxu0 %vm514_vm0, %v513_v0  ;;  %p488_p13 = por %p487_p12, %p486_p11 }
  0x25   :  { %420 = vmatpush3.msra.mxu1 %v45_v2  ;;  %421 = vmatprep.mubr.msk.f32.mxu1 %vm514_vm0, %v513_v0 }
  0x26   :  { %p489_p0 = pnand %p488_p13, %p482_p10 }
  0xe3   :  { %v119_v7 = vpop.f32.mrf.mxu0  ;;  %v195_v8 = vpop.f32.mrf.mxu1 }
  0xe4   :  { %v200_v9 = vsel %vm199_vm2, %v119_v7, -inf  ;;  %v203_v12 = vsel %vm199_vm2, %v195_v8, -inf }
  0xe5   :  { %201 = vmax.xlane.f32.xlu0 %v200_v9  ;;  %v408_v10 = vpop.f32.mrf.mxu0  ;;  %v413_v11 = vpop.f32.mrf.mxu1 }
  0xe9   :  { %204 = vmax.xlane.f32.xlu0 %v203_v12 }
 0x16e   :  { %v202_v13 = vpop.xlane.xlu0 %201 }
 0x16f   :  { %v206_v14 = vsub.f32 %v119_v7, %v202_v13 }
 0x171   :  { %v208_v15 = vmul.f32 1.442695, %v206_v14 }
 0x172   :  { %v205_v16 = vpop.xlane.xlu0 %204 }
 0x173   :  { %433 = vpow2.f32 %v208_v15  ;;  %v207_v17 = vsub.f32 %v195_v8, %v205_v16 }
 0x175   :  { %v210_v18 = vmul.f32 1.442695, %v207_v17 }
 0x177   :  { %435 = vpow2.f32 %v210_v18 }
 0x180   :  { %v434_v19 = vpop.eup %433 }
 0x181   :  { %v212_v20 = vsel %vm199_vm2, %v434_v19, 0.0 }
 0x182   :  { %213 = vadd.xlane.f32.xlu1 %v212_v20 }
 0x184   :  { %v436_v21 = vpop.eup %435 }
 0x185   :  { %v215_v22 = vsel %vm199_vm2, %v436_v21, 0.0 }
 0x186   :  { %216 = vadd.xlane.f32.xlu1 %v215_v22 }
 0x20b   :  { %v214_v23 = vpop.xlane.xlu1 %213 }
 0x20c   :  { %437 = vrcp.f32 %v214_v23 }
 0x20f   :  { %v217_v24 = vpop.xlane.xlu1 %216 }
 0x210   :  { %439 = vrcp.f32 %v217_v24 }
 0x219   :  { %v438_v25 = vpop.eup %437 }
 0x21a   :  { %v220_v26 = vmul.f32 %v438_v25, %v434_v19 }
 0x21c   :  { %417 = vmatmul.mubr.msk.f32.vlgmr.msra.gmra.mxu0 %vm222_vm3, %v220_v26 }
 0x21d   :  { %v440_v27 = vpop.eup %439 }
 0x21e   :  { %v221_v28 = vmul.f32 %v440_v27, %v436_v21 }
 0x220   :  { %422 = vmatmul.mubr.msk.f32.vlgmr.msra.gmra.mxu1 %vm222_vm3, %v221_v28 }
 0x2dc   :  { %v292_v29 = vpop.f32.mrf.mxu0 }
 0x2dd   :  { %370 = vst.msk [vmem:[#allocation7] sm:$0x1] %vm369_vm4, %v292_v29 }
 0x2de   :  { %v418_v30 = vpop.f32.mrf.mxu0 }
 0x2e0   :  { %v365_v31 = vpop.f32.mrf.mxu1 }
 0x2e1   :  { %371 = vst.msk [vmem:[#allocation7 + $0x1] sm:$0x1] %vm369_vm4, %v365_v31 }
 0x2e2   :  { %v423_v32 = vpop.f32.mrf.mxu1 }
 0x2e3   :  { %492 = shalt.err (!%p489_p0)
}
 0x2e4   :  { %383 = dma.vmem_to_hbm [thread:$0]  %s378_s1, 32, %s556_s2, [#allocation4], %s508_s12, %s508_s12, %s509_s13  }
 0x2e5   :  { %505 = dma.done.wait [#allocation4], 32  }
 0x2e6   :  { %506 = vsyncadd [#allocation4], 4294967264 }
 0x2e7   :  { %387 = vsyncpa [#allocation3], 1 }
 0x2e8   :  { %388 = vsyncpa [#allocation6], 1 }
 0x2e9   :  { %389 = vsyncpa [#allocation4], 1 }

</bundles_post_ra>
